<compile_context>
chip_gen: v7x
topology: tpu7x:2x2x1
jax: 0.10.0
libtpu: 0.0.40
codegen_flags: <defaults>
</compile_context>

<pallas_src>
import jax
import jax.numpy as jnp
from jax.experimental import pallas as pl
from jax.experimental.pallas import tpu as pltpu


def _round_up(n, m):
    return ((n + m - 1) // m) * m


def _softplus(x):
    # PyTorch Softplus(beta=1, threshold=20): x if x > 20 else log(1 + exp(x))
    return jnp.where(x > 20.0, x, jnp.log1p(jnp.exp(jnp.minimum(x, 20.0))))


# ---------------------------------------------------------------------------
# Kernel: three fused (matmul + bias + activation) layers on one batch tile.
# Weights/biases are resident across the batch grid (constant index_map).
# ---------------------------------------------------------------------------
def encoder_kernel(x_ref, w1_ref, b1_ref, w2_ref, b2_ref, w3_ref, b3_ref, o_ref):
    x = x_ref[...]

    # Layer 1: Linear (BN folded) -> (Dropout = id, eval) -> ReLU
    h = jnp.dot(x, w1_ref[...], preferred_element_type=jnp.float32)
    h = jnp.maximum(h + b1_ref[...], 0.0)

    # Layer 2: Linear (BN folded) -> (Dropout = id, eval) -> ReLU
    h = jnp.dot(h.astype(w2_ref.dtype), w2_ref[...],
                preferred_element_type=jnp.float32)
    h = jnp.maximum(h + b2_ref[...], 0.0)

    # Layer 3: Linear (BN folded) -> Softplus
    z = jnp.dot(h.astype(w3_ref.dtype), w3_ref[...],
                preferred_element_type=jnp.float32)
    z = z + b3_ref[...]
    o_ref[...] = _softplus(z).astype(o_ref.dtype)


# ---------------------------------------------------------------------------
# Wrapper glue: fold BN into the linears, pad output lanes, tile the batch.
# ---------------------------------------------------------------------------
def _fold_bn_into_linear(w, b, gamma, beta, mean, var, eps=1e-5):
    scale = gamma / jnp.sqrt(var + eps)          # (dout,)
    shift = beta - mean * scale                  # (dout,)
    return w * scale[None, :], b * scale + shift


def _prepare_operands(params, matmul_dtype):
    w1, b1 = _fold_bn_into_linear(params["w1"], params["b1"], params["g1"],
                                  params["be1"], params["m1"], params["v1"])
    w2, b2 = _fold_bn_into_linear(params["w2"], params["b2"], params["g2"],
                                  params["be2"], params["m2"], params["v2"])
    w3, b3 = _fold_bn_into_linear(params["w3"], params["b3"], params["g3"],
                                  params["be3"], params["m3"], params["v3"])

    out_dim = w3.shape[1]
    out_pad = _round_up(out_dim, 128)            # lane-dense output store
    if out_pad != out_dim:
        w3 = jnp.pad(w3, ((0, 0), (0, out_pad - out_dim)))
        b3 = jnp.pad(b3, (0, out_pad - out_dim))

    # Matmul operands in bf16 (f32 accumulation); biases stay f32 (VPU path).
    ops = (
        w1.astype(matmul_dtype), b1.astype(jnp.float32)[None, :],
        w2.astype(matmul_dtype), b2.astype(jnp.float32)[None, :],
        w3.astype(matmul_dtype), b3.astype(jnp.float32)[None, :],
    )
    return ops, out_dim, out_pad


def encoder_forward(x, params, *, matmul_dtype=jnp.bfloat16, block_batch=256):
    """x: (N, input_dim) float32. params: dict of weights (see init_params)."""
    N, din = x.shape
    (w1, b1, w2, b2, w3, b3), out_dim, out_pad = _prepare_operands(
        params, matmul_dtype)
    dh = w1.shape[1]

    # Batch tile: multiple of 8 sublanes, capped so double-buffered x / out
    # tiles stay far inside the scoped-VMEM default even on v7x.
    tb = min(block_batch, _round_up(N, 8))
    n_pad = _round_up(N, tb)
    xp = x if n_pad == N else jnp.pad(x, ((0, n_pad - N), (0, 0)))
    xp = xp.astype(matmul_dtype)

    grid = (n_pad // tb,)

    flops = 2 * n_pad * (din * dh + dh * dh + dh * out_pad)
    bytes_accessed = (
        xp.size * xp.dtype.itemsize
        + n_pad * out_pad * 4
        + sum(a.size * a.dtype.itemsize for a in (w1, b1, w2, b2, w3, b3))
    )
    cost = pl.CostEstimate(flops=flops,
                           transcendentals=2 * n_pad * out_pad,
                           bytes_accessed=bytes_accessed)

    out = pl.pallas_call(
        encoder_kernel,
        out_shape=jax.ShapeDtypeStruct((n_pad, out_pad), jnp.float32),
        grid=grid,
        in_specs=[
            pl.BlockSpec((tb, din), lambda i: (i, 0)),       # x: tiled on batch
            pl.BlockSpec((din, dh), lambda i: (0, 0)),       # w1: resident
            pl.BlockSpec((1, dh), lambda i: (0, 0)),         # b1
            pl.BlockSpec((dh, dh), lambda i: (0, 0)),        # w2
            pl.BlockSpec((1, dh), lambda i: (0, 0)),         # b2
            pl.BlockSpec((dh, out_pad), lambda i: (0, 0)),   # w3 (lane-padded)
            pl.BlockSpec((1, out_pad), lambda i: (0, 0)),    # b3
        ],
        out_specs=pl.BlockSpec((tb, out_pad), lambda i: (i, 0)),
        compiler_params=pltpu.CompilerParams(
            dimension_semantics=("parallel",)),
        cost_estimate=cost,
    )(xp, w1, b1, w2, b2, w3, b3)

    return out[:N, :out_dim]


# ---------------------------------------------------------------------------
# Parameter init + references (test harness only).
# ---------------------------------------------------------------------------
def init_params(key, input_dim, hidden_dim, output_dim):
    ks = jax.random.split(key, 18)

    def lin(kw, kb, din, dout):
        bound = 1.0 / jnp.sqrt(din)
        w = jax.random.uniform(kw, (din, dout), jnp.float32, -bound, bound)
        b = jax.random.uniform(kb, (dout,), jnp.float32, -bound, bound)
        return w, b

    w1, b1 = lin(ks[0], ks[1], input_dim, hidden_dim)
    w2, b2 = lin(ks[2], ks[3], hidden_dim, hidden_dim)
    w3, b3 = lin(ks[4], ks[5], hidden_dim, output_dim)

    def bn(kg, kb, km, kv, d):
        gamma = 1.0 + 0.1 * jax.random.normal(kg, (d,), jnp.float32)
        beta = 0.1 * jax.random.normal(kb, (d,), jnp.float32)
        mean = 0.1 * jax.random.normal(km, (d,), jnp.float32)
        var = 1.0 + 0.1 * jax.random.uniform(kv, (d,), jnp.float32)
        return gamma, beta, mean, var

    g1, be1, m1, v1 = bn(ks[6], ks[7], ks[8], ks[9], hidden_dim)
    g2, be2, m2, v2 = bn(ks[10], ks[11], ks[12], ks[13], hidden_dim)
    g3, be3, m3, v3 = bn(ks[14], ks[15], ks[16], ks[17], output_dim)

    return dict(
        w1=w1, b1=b1, g1=g1, be1=be1, m1=m1, v1=v1,
        w2=w2, b2=b2, g2=g2, be2=be2, m2=m2, v2=v2,
        w3=w3, b3=b3, g3=g3, be3=be3, m3=m3, v3=v3,
    )


def encoder_reference(x, params):
    """Full-f32 pure-JAX eval-mode reference."""
    def bn(h, g, b, m, v, eps=1e-5):
        return (h - m) / jnp.sqrt(v + eps) * g + b

    h = x @ params["w1"] + params["b1"]
    h = jnp.maximum(bn(h, params["g1"], params["be1"], params["m1"], params["v1"]), 0.0)
    h = h @ params["w2"] + params["b2"]
    h = jnp.maximum(bn(h, params["g2"], params["be2"], params["m2"], params["v2"]), 0.0)
    z = h @ params["w3"] + params["b3"]
    z = bn(z, params["g3"], params["be3"], params["m3"], params["v3"])
    return _softplus(z)


def encoder_matched_reference(x, params, matmul_dtype=jnp.bfloat16):
    """Reference using the exact same folded/cast operands as the kernel."""
    (w1, b1, w2, b2, w3, b3), out_dim, _ = _prepare_operands(params, matmul_dtype)
    h = jnp.dot(x.astype(matmul_dtype), w1, preferred_element_type=jnp.float32)
    h = jnp.maximum(h + b1, 0.0)
    h = jnp.dot(h.astype(matmul_dtype), w2, preferred_element_type=jnp.float32)
    h = jnp.maximum(h + b2, 0.0)
    z = jnp.dot(h.astype(matmul_dtype), w3, preferred_element_type=jnp.float32)
    z = z + b3
    return _softplus(z)[:, :out_dim]


if __name__ == "__main__":
    key = jax.random.PRNGKey(0)
    k_x, k_p = jax.random.split(key)

    batch, input_dim, hidden_dim, output_dim = 16, 32, 64, 16
    x = jax.random.normal(k_x, (batch, input_dim), jnp.float32)
    params = init_params(k_p, input_dim, hidden_dim, output_dim)

    out = encoder_forward(x, params)
    out = jax.block_until_ready(out)
    assert out.shape == (batch, output_dim)

    # Exact check against a reference built from the same folded bf16 operands.
    ref_exact = encoder_matched_reference(x, params)
    assert jnp.allclose(out, ref_exact, atol=2e-4, rtol=2e-4), \
        float(jnp.max(jnp.abs(out - ref_exact)))

    # Approximate check against the full-f32 eval-mode semantics
    # (difference = standard bf16-matmul tolerance only).
    ref_f32 = encoder_reference(x, params)
    assert jnp.allclose(out, ref_f32, atol=5e-2, rtol=5e-2), \
        float(jnp.max(jnp.abs(out - ref_f32)))

    print("KERNEL_OK")
</pallas_src>

<mosaic_0001>
module attributes {stable_mosaic.version = 11 : i64} {
  func.func @encoder_kernel(%arg0: i32, %arg1: memref<16x32xbf16, #tpu.memory_space<vmem>>, %arg2: memref<32x64xbf16, #tpu.memory_space<vmem>>, %arg3: memref<1x64xf32, #tpu.memory_space<vmem>>, %arg4: memref<64x64xbf16, #tpu.memory_space<vmem>>, %arg5: memref<1x64xf32, #tpu.memory_space<vmem>>, %arg6: memref<64x128xbf16, #tpu.memory_space<vmem>>, %arg7: memref<1x128xf32, #tpu.memory_space<vmem>>, %arg8: memref<16x128xf32, #tpu.memory_space<vmem>>) attributes {dimension_semantics = [#tpu.dimension_semantics<parallel>], iteration_bounds = array<i64: 1>, scalar_prefetch = 0 : i64, scratch_operands = 0 : i64, tpu.core_type = #tpu.core_type<tc>, window_params = [{transform_indices = @transform_0, window_bounds = array<i64: 16, 32>}, {pipeline_mode = #tpu.pipeline_mode<synchronous>, transform_indices = @transform_1, window_bounds = array<i64: 32, 64>}, {pipeline_mode = #tpu.pipeline_mode<synchronous>, transform_indices = @transform_2, window_bounds = array<i64: 1, 64>}, {pipeline_mode = #tpu.pipeline_mode<synchronous>, transform_indices = @transform_3, window_bounds = array<i64: 64, 64>}, {pipeline_mode = #tpu.pipeline_mode<synchronous>, transform_indices = @transform_4, window_bounds = array<i64: 1, 64>}, {pipeline_mode = #tpu.pipeline_mode<synchronous>, transform_indices = @transform_5, window_bounds = array<i64: 64, 128>}, {pipeline_mode = #tpu.pipeline_mode<synchronous>, transform_indices = @transform_6, window_bounds = array<i64: 1, 128>}, {transform_indices = @transform_7, window_bounds = array<i64: 16, 128>}]} {
    %c0 = arith.constant 0 : index
    %c0_0 = arith.constant 0 : index
    %0 = vector.load %arg1[%c0, %c0_0] : memref<16x32xbf16, #tpu.memory_space<vmem>>, vector<16x32xbf16>
    %c0_1 = arith.constant 0 : index
    %c0_2 = arith.constant 0 : index
    %1 = vector.load %arg2[%c0_1, %c0_2] : memref<32x64xbf16, #tpu.memory_space<vmem>>, vector<32x64xbf16>
    %cst = arith.constant dense<0.000000e+00> : vector<16x64xf32>
    %2 = tpu.matmul %0, %1, %cst {dimension_numbers = #tpu.dot_dimension_numbers<[1], [0], [0], [1], [0, 0, 1, 1], [], []>} : vector<16x32xbf16>, vector<32x64xbf16>, vector<16x64xf32> -> vector<16x64xf32>
    %c0_3 = arith.constant 0 : index
    %c0_4 = arith.constant 0 : index
    %3 = vector.load %arg3[%c0_3, %c0_4] : memref<1x64xf32, #tpu.memory_space<vmem>>, vector<1x64xf32>
    %4 = vector.broadcast %3 : vector<1x64xf32> to vector<16x64xf32>
    %5 = arith.addf %2, %4 : vector<16x64xf32>
    %cst_5 = arith.constant 0.000000e+00 : f32
    %6 = vector.broadcast %cst_5 : f32 to vector<16x64xf32>
    %7 = arith.maximumf %5, %6 : vector<16x64xf32>
    %8 = arith.truncf %7 : vector<16x64xf32> to vector<16x64xbf16>
    %c0_6 = arith.constant 0 : index
    %c0_7 = arith.constant 0 : index
    %9 = vector.load %arg4[%c0_6, %c0_7] : memref<64x64xbf16, #tpu.memory_space<vmem>>, vector<64x64xbf16>
    %cst_8 = arith.constant dense<0.000000e+00> : vector<16x64xf32>
    %10 = tpu.matmul %8, %9, %cst_8 {dimension_numbers = #tpu.dot_dimension_numbers<[1], [0], [0], [1], [0, 0, 1, 1], [], []>} : vector<16x64xbf16>, vector<64x64xbf16>, vector<16x64xf32> -> vector<16x64xf32>
    %c0_9 = arith.constant 0 : index
    %c0_10 = arith.constant 0 : index
    %11 = vector.load %arg5[%c0_9, %c0_10] : memref<1x64xf32, #tpu.memory_space<vmem>>, vector<1x64xf32>
    %12 = vector.broadcast %11 : vector<1x64xf32> to vector<16x64xf32>
    %13 = arith.addf %10, %12 : vector<16x64xf32>
    %cst_11 = arith.constant 0.000000e+00 : f32
    %14 = vector.broadcast %cst_11 : f32 to vector<16x64xf32>
    %15 = arith.maximumf %13, %14 : vector<16x64xf32>
    %16 = arith.truncf %15 : vector<16x64xf32> to vector<16x64xbf16>
    %c0_12 = arith.constant 0 : index
    %c0_13 = arith.constant 0 : index
    %17 = vector.load %arg6[%c0_12, %c0_13] : memref<64x128xbf16, #tpu.memory_space<vmem>>, vector<64x128xbf16>
    %cst_14 = arith.constant dense<0.000000e+00> : vector<16x128xf32>
    %18 = tpu.matmul %16, %17, %cst_14 {dimension_numbers = #tpu.dot_dimension_numbers<[1], [0], [0], [1], [0, 0, 1, 1], [], []>} : vector<16x64xbf16>, vector<64x128xbf16>, vector<16x128xf32> -> vector<16x128xf32>
    %c0_15 = arith.constant 0 : index
    %c0_16 = arith.constant 0 : index
    %19 = vector.load %arg7[%c0_15, %c0_16] : memref<1x128xf32, #tpu.memory_space<vmem>>, vector<1x128xf32>
    %20 = vector.broadcast %19 : vector<1x128xf32> to vector<16x128xf32>
    %21 = arith.addf %18, %20 : vector<16x128xf32>
    %cst_17 = arith.constant 2.000000e+01 : f32
    %22 = vector.broadcast %cst_17 : f32 to vector<16x128xf32>
    %23 = arith.cmpf ogt, %21, %22 : vector<16x128xf32>
    %cst_18 = arith.constant 2.000000e+01 : f32
    %24 = vector.broadcast %cst_18 : f32 to vector<16x128xf32>
    %25 = arith.minimumf %21, %24 : vector<16x128xf32>
    %26 = math.exp %25 : vector<16x128xf32>
    %27 = math.log1p %26 : vector<16x128xf32>
    %28 = arith.select %23, %21, %27 : vector<16x128xi1>, vector<16x128xf32>
    %c0_19 = arith.constant 0 : index
    %c0_20 = arith.constant 0 : index
    %29 = vector.load %arg8[%c0_19, %c0_20] : memref<16x128xf32, #tpu.memory_space<vmem>>, vector<16x128xf32>
    tpu.vector_store %arg8[%c0_19, %c0_20], %28 {strides = array<i32>} : memref<16x128xf32, #tpu.memory_space<vmem>>, vector<16x128xf32>,
    return
  }
  func.func @transform_0(%arg0: i32) -> (i32, i32) {
    %c0_i32 = arith.constant 0 : i32
    %c0_i32_0 = arith.constant 0 : i32
    return %arg0, %c0_i32 : i32, i32
  }
  func.func @transform_1(%arg0: i32) -> (i32, i32) {
    %c0_i32 = arith.constant 0 : i32
    %c0_i32_0 = arith.constant 0 : i32
    %c0_i32_1 = arith.constant 0 : i32
    return %c0_i32, %c0_i32_0 : i32, i32
  }
  func.func @transform_2(%arg0: i32) -> (i32, i32) {
    %c0_i32 = arith.constant 0 : i32
    %c0_i32_0 = arith.constant 0 : i32
    %c0_i32_1 = arith.constant 0 : i32
    return %c0_i32, %c0_i32_0 : i32, i32
  }
  func.func @transform_3(%arg0: i32) -> (i32, i32) {
    %c0_i32 = arith.constant 0 : i32
    %c0_i32_0 = arith.constant 0 : i32
    %c0_i32_1 = arith.constant 0 : i32
    return %c0_i32, %c0_i32_0 : i32, i32
  }
  func.func @transform_4(%arg0: i32) -> (i32, i32) {
    %c0_i32 = arith.constant 0 : i32
    %c0_i32_0 = arith.constant 0 : i32
    %c0_i32_1 = arith.constant 0 : i32
    return %c0_i32, %c0_i32_0 : i32, i32
  }
  func.func @transform_5(%arg0: i32) -> (i32, i32) {
    %c0_i32 = arith.constant 0 : i32
    %c0_i32_0 = arith.constant 0 : i32
    %c0_i32_1 = arith.constant 0 : i32
    return %c0_i32, %c0_i32_0 : i32, i32
  }
  func.func @transform_6(%arg0: i32) -> (i32, i32) {
    %c0_i32 = arith.constant 0 : i32
    %c0_i32_0 = arith.constant 0 : i32
    %c0_i32_1 = arith.constant 0 : i32
    return %c0_i32, %c0_i32_0 : i32, i32
  }
  func.func @transform_7(%arg0: i32) -> (i32, i32) {
    %c0_i32 = arith.constant 0 : i32
    %c0_i32_0 = arith.constant 0 : i32
    return %arg0, %c0_i32 : i32, i32
  }
}

</mosaic_0001>

<bundles_post_ra>
// kernel: tpu_custom_call.1
= control target key start
LH: loop header
LB: loop body
LE: loop exit
PB: predicated region body
PF: predicated region fallthrough
CT: control target
= control target key end

     0   :  { %12 = vsyncpa [#allocation3], 0  ;;  %s741_s0 = inlined_call_operand.hbm [shape: bf16[16,32], index: 0, kind: input, shape index: {}]   ;;  %s742_s1 = inlined_call_operand.hbm [shape: bf16[32,64], index: 1, kind: input, shape index: {}]   ;;  %s743_s2 = inlined_call_operand.vmem [shape: f32[1,64], index: 2, kind: input, shape index: {}]   ;;  %s744_s3 = inlined_call_operand.hbm [shape: bf16[64,64], index: 3, kind: input, shape index: {}]   ;;  %s745_s4 = inlined_call_operand.vmem [shape: f32[1,64], index: 4, kind: input, shape index: {}]   ;;  %s746_s5 = inlined_call_operand.hbm [shape: bf16[64,128], index: 5, kind: input, shape index: {}]   ;;  %s747_s6 = inlined_call_operand.vmem [shape: f32[1,128], index: 6, kind: input, shape index: {}]   ;;  %s748_s7 = inlined_call_operand.hbm [shape: f32[16,128], index: 7, kind: output, shape index: {}]  }
   0x1   :  { %13 = vsyncpa [#allocation6], 0 }
   0x2   :  { %14 = vsyncpa [#allocation9], 0 }
   0x3   :  { %15 = vsyncpa [#allocation4], 0  ;;  %s590_s24 = smov [#allocation5]   ;;  %s591_s26 = smov [#allocation2]  }
   0x4   :  { %s33_s25 = sshll.u32 %s590_s24, 4  ;;  %s21_s27 = sshll.u32 %s591_s26, 4  ;;  %s34_s25 = int_to_ptr.vmem [resolvable:$true] %s33_s25  ;;  %s641_s27 = int_to_ptr.vmem [resolvable:$true] %s21_s27 }
   0x5   :  { %s472_s30 = scalar_lea.hbm %s742_s1, 256 }
   0x6   :  { %p473_p0 = scmp.ne.s32.totalorder %s742_s1, %s472_s30  ;;  %p476_p1 = scmp.lt.u32.totalorder %s472_s30, %s742_s1 }
   0x8   :  { %p478_p2 = pnand %p476_p1, %p473_p0 }
   0xa   :  { %481 = shalt.err (!%p478_p2)
}
   0xb   :  { %s482_s12 = scalar_lea.vmem %s34_s25, 256  ;;  %p487_p4 = scmp.lt.s32.totalorder %s34_s25, %s34_s25 }
   0xc   :  { %p483_p3 = scmp.ne.s32.totalorder %s34_s25, %s482_s12  ;;  %p488_p5 = scmp.lt.s32.totalorder %s482_s12, %s482_s12 }
   0xe   :  { %p489_p6 = por %p488_p5, %p487_p4 }
  0x10   :  { %p490_p7 = pnand %p489_p6, %p483_p3 }
  0x12   :  { %493 = shalt.err (!%p490_p7)
}
  0x13   :  { %s592_s13 = smov 64   ;;  %s593_s14 = smov 4  }
  0x14   :  { %39 = dma.hbm_to_vmem [thread:$0]  %s742_s1, 256, %s34_s25, [#allocation6], %s592_s13, %s592_s13, %s593_s14  }
  0x15   :  { %s494_s19 = scalar_lea.hbm %s741_s0, 128 }
  0x16   :  { %p495_p8 = scmp.ne.s32.totalorder %s741_s0, %s494_s19  ;;  %p498_p9 = scmp.lt.u32.totalorder %s494_s19, %s741_s0 }
  0x18   :  { %p500_p10 = pnand %p498_p9, %p495_p8 }
  0x1a   :  { %503 = shalt.err (!%p500_p10)
}
  0x1b   :  { %s504_s24 = scalar_lea.vmem %s641_s27, 128  ;;  %p509_p12 = scmp.lt.s32.totalorder %s641_s27, %s641_s27 }
  0x1c   :  { %p505_p11 = scmp.ne.s32.totalorder %s641_s27, %s504_s24  ;;  %p510_p13 = scmp.lt.s32.totalorder %s504_s24, %s504_s24 }
  0x1e   :  { %p511_p0 = por %p510_p13, %p509_p12 }
  0x20   :  { %p512_p1 = pnand %p511_p0, %p505_p11 }
  0x22   :  { %515 = shalt.err (!%p512_p1)
}
  0x23   :  { %27 = dma.hbm_to_vmem [thread:$0]  %s741_s0, 128, %s641_s27, [#allocation3], %s592_s13, %s592_s13, %s593_s14  }
  0x24   :  { %s594_s26 = smov [#allocation7]   ;;  %s595_s29 = smov [#allocation8]  }
  0x25   :  { %s47_s28 = sshll.u32 %s594_s26, 4  ;;  %s61_s30 = sshll.u32 %s595_s29, 4  ;;  %s48_s28 = int_to_ptr.vmem [resolvable:$true] %s47_s28  ;;  %s678_s30 = int_to_ptr.vmem [resolvable:$true] %s61_s30 }
  0x26   :  { %s516_s10 = scalar_lea.hbm %s744_s3, 512 }
  0x27   :  { %p517_p2 = scmp.ne.s32.totalorder %s744_s3, %s516_s10  ;;  %p520_p3 = scmp.lt.u32.totalorder %s516_s10, %s744_s3 }
  0x29   :  { %p522_p4 = pnand %p520_p3, %p517_p2 }
  0x2b   :  { %525 = shalt.err (!%p522_p4)
}
  0x2c   :  { %s526_s0 = scalar_lea.vmem %s48_s28, 512  ;;  %p531_p6 = scmp.lt.s32.totalorder %s48_s28, %s48_s28 }
  0x2d   :  { %p527_p5 = scmp.ne.s32.totalorder %s48_s28, %s526_s0  ;;  %p532_p7 = scmp.lt.s32.totalorder %s526_s0, %s526_s0 }
  0x2f   :  { %p533_p8 = por %p532_p7, %p531_p6 }
  0x31   :  { %p534_p9 = pnand %p533_p8, %p527_p5 }
  0x33   :  { %537 = shalt.err (!%p534_p9)
}
  0x34   :  { %53 = dma.hbm_to_vmem [thread:$0]  %s744_s3, 512, %s48_s28, [#allocation6], %s592_s13, %s592_s13, %s593_s14  }
  0x35   :  { %s538_s20 = scalar_lea.hbm %s746_s5, 512 }
  0x36   :  { %p539_p10 = scmp.ne.s32.totalorder %s746_s5, %s538_s20  ;;  %p542_p11 = scmp.lt.u32.totalorder %s538_s20, %s746_s5 }
  0x38   :  { %p544_p12 = pnand %p542_p11, %p539_p10 }
  0x3a   :  { %547 = shalt.err (!%p544_p12)
}
  0x3b   :  { %s548_s1 = scalar_lea.vmem %s678_s30, 512  ;;  %p553_p0 = scmp.lt.s32.totalorder %s678_s30, %s678_s30 }
  0x3c   :  { %p549_p13 = scmp.ne.s32.totalorder %s678_s30, %s548_s1  ;;  %p554_p1 = scmp.lt.s32.totalorder %s548_s1, %s548_s1 }
  0x3e   :  { %p555_p2 = por %p554_p1, %p553_p0 }
  0x40   :  { %p556_p3 = pnand %p555_p2, %p549_p13 }
  0x42   :  { %559 = shalt.err (!%p556_p3)
}
  0x43   :  { %67 = dma.hbm_to_vmem [thread:$0]  %s746_s5, 512, %s678_s30, [#allocation9], %s592_s13, %s592_s13, %s593_s14  }
  0x44   :  { %582 = dma.done.wait [#allocation3], 128  }
  0x45   :  { %583 = vsyncadd [#allocation3], 4294967168 }
  0x46   :  { %584 = dma.done.wait [#allocation6], 768  }
  0x47   :  { %585 = vsyncadd [#allocation6], 4294966528 }
  0x48   :  { %586 = dma.done.wait [#allocation9], 512  }
  0x49   :  { %587 = vsyncadd [#allocation9], 4294966784  ;;  %v596_v0 = vmov 0.0   ;;  %vm597_vm0 = vmmov 0   ;;  %v453_v1 = vld [vmem:[#allocation5] sm:$0xff]   ;;  %v454_v2 = vld [vmem:[#allocation5 + $0x8] sm:$0xff]  }
  0x4a   :  { %410 = vmatprep.subr.bf16.mxu0 %v596_v0  ;;  %414 = vmatprep.mubr.msk.bf16.mxu0 %vm597_vm0, %v596_v0  ;;  %v456_v3 = vld [vmem:[#allocation7] sm:$0xff]   ;;  %v455_v4 = vld [vmem:[#allocation2] sm:$0xff]   ;;  %vm113_vm1 = vcmask 261120   ;;  %v458_v6 = vld [vmem:[#allocation7 + $0x10] sm:$0xff]   ;;  %vm200_vm2 = vcmask 523264  }
  0x4b   :  { %418 = vmatprep.subr.bf16.mxu1 %v596_v0  ;;  %426 = vmatprep.mubr.msk.bf16.mxu1 %vm597_vm0, %v596_v0  ;;  %v457_v5 = vld [vmem:[#allocation7 + $0x8] sm:$0xff]   ;;  %v459_v7 = vld [vmem:[#allocation7 + $0x18] sm:$0xff]   ;;  %v460_v8 = vld [vmem:[#allocation8] sm:$0xff]  }
  0x4c   :  { %411 = vmatpush3.bf16.msra.mxu0 %v453_v1  ;;  %419 = vmatpush3.bf16.msra.mxu1 %v456_v3  ;;  %v461_v9 = vld [vmem:[#allocation8 + $0x8] sm:$0xff]   ;;  %v462_v20 = vld [vmem:[#allocation8 + $0x10] sm:$0xff]   ;;  %v463_v21 = vld [vmem:[#allocation8 + $0x18] sm:$0xff]  }
  0x4d   :  { %412 = vmatprep.subr.bf16.mxu0 %v596_v0  ;;  %420 = vmatprep.subr.bf16.mxu1 %v596_v0  ;;  %v380_v10 = vld [vmem:[%s743_s2] ss:$0 sm:$0xff] }
  0x4e   :  { %v385_v22 = vld [vmem:[%s745_s4] ss:$0 sm:$0xff]  ;;  %s598_s4 = smov [#allocation10]  }
  0x4f   :  { %v391_v32 = vld [vmem:[%s747_s6] ss:$0 sm:$0xff]  ;;  %s366_s6 = sshll.u32 %s598_s4, 4  ;;  %s367_s6 = int_to_ptr.vmem [resolvable:$true] %s366_s6 }
  0x50   :  { %413 = vmatpush3.bf16.msra.mxu0 %v454_v2  ;;  %421 = vmatpush3.bf16.msra.mxu1 %v457_v5  ;;  %s560_s29 = scalar_lea.vmem %s367_s6, 256  ;;  %p565_p5 = scmp.lt.s32.totalorder %s367_s6, %s367_s6 }
  0x51   :  { %430 = vmatprep.subr.bf16.mxu0 %v596_v0  ;;  %422 = vmatprep.subr.bf16.mxu1 %v596_v0  ;;  %p561_p4 = scmp.ne.s32.totalorder %s367_s6, %s560_s29  ;;  %p566_p6 = scmp.lt.s32.totalorder %s560_s29, %s560_s29 }
  0x53   :  { %415 = vmatmul.mubr.msk.bf16.vlgmr.msra.gmra.mrb[0].mxu0 %vm113_vm1, %v455_v4  ;;  %p567_p7 = por %p566_p6, %p565_p5 }
  0x54   :  { %438 = vmatprep.mubr.msk.bf16.mxu0 %vm597_vm0, %v596_v0  ;;  %423 = vmatpush3.bf16.msra.mxu1 %v458_v6 }
  0x55   :  { %424 = vmatprep.subr.bf16.mxu1 %v596_v0  ;;  %431 = vmatpush3.bf16.msra.mxu0 %v460_v8  ;;  %p568_p8 = pnand %p567_p7, %p561_p4 }
  0x56   :  { %432 = vmatprep.subr.bf16.mxu0 %v596_v0 }
  0x58   :  { %425 = vmatpush3.bf16.msra.mxu1 %v459_v7 }
  0x59   :  { %433 = vmatpush3.bf16.msra.mxu0 %v461_v9 }
  0x5a   :  { %434 = vmatprep.subr.bf16.mxu0 %v596_v0 }
  0x5d   :  { %435 = vmatpush3.bf16.msra.mxu0 %v462_v20 }
  0x5e   :  { %436 = vmatprep.subr.bf16.mxu0 %v596_v0 }
  0x61   :  { %437 = vmatpush3.bf16.msra.mxu0 %v463_v21 }
 0x126   :  { %v151_v11 = vpop.f32.mrb[0].mxu0 }
 0x127   :  { %v152_v12 = vadd.f32 %v380_v10, %v151_v11  ;;  %v416_v13 = vpop.f32.mrb[1].mxu0 }
 0x128   :  { %v154_v14 = vpop.f32.mrb[2].mxu0 }
 0x129   :  { %v155_v15 = vadd.f32 %v380_v10, %v154_v14  ;;  %v417_v16 = vpop.f32.mrb[3].mxu0  ;;  %v158_v17 = vmax.f32 %v152_v12, 0.0 }
 0x12b   :  { %v159_v18 = vmax.f32 %v155_v15, 0.0 }
 0x12d   :  { %v160_v19 = vpack.c.bf16 %v159_v18, %v158_v17 }
 0x12f   :  { %427 = vmatmul.mubr.msk.bf16.vlgmr.msra.gmra.mrb[0].mxu1 %vm200_vm2, %v160_v19 }
 0x202   :  { %v238_v23 = vpop.f32.mrb[0].mxu1 }
 0x203   :  { %v239_v24 = vadd.f32 %v385_v22, %v238_v23  ;;  %v428_v25 = vpop.f32.mrb[1].mxu1 }
 0x204   :  { %v241_v26 = vpop.f32.mrb[2].mxu1 }
 0x205   :  { %v242_v27 = vadd.f32 %v385_v22, %v241_v26  ;;  %v429_v28 = vpop.f32.mrb[3].mxu1  ;;  %v245_v29 = vmax.f32 %v239_v24, 0.0 }
 0x207   :  { %v246_v30 = vmax.f32 %v242_v27, 0.0 }
 0x209   :  { %v247_v31 = vpack.c.bf16 %v246_v30, %v245_v29 }
 0x20b   :  { %439 = vmatmul.mubr.msk.bf16.vlgmr.msra.gmra.mrb[4].mxu0 %vm200_vm2, %v247_v31 }
 0x2de   :  { %v324_v33 = vpop.f32.mrb[4].mxu0 }
 0x2df   :  { %v325_v34 = vadd.f32 %v391_v32, %v324_v33  ;;  %v440_v35 = vpop.f32.mrb[5].mxu0 }
 0x2e0   :  { %v327_v36 = vpop.f32.mrb[6].mxu0 }
 0x2e1   :  { %v333_v37 = vmin.f32 %v325_v34, 20.0  ;;  %v328_v38 = vadd.f32 %v391_v32, %v327_v36  ;;  %v441_v39 = vpop.f32.mrb[7].mxu0  ;;  %vm331_vm4 = vcmp.gt.f32.partialorder %v325_v34, 20.0 }
 0x2e3   :  { %v335_v40 = vmul.f32 1.442695, %v333_v37  ;;  %v334_v41 = vmin.f32 %v328_v38, 20.0  ;;  %vm332_vm6 = vcmp.gt.f32.partialorder %v328_v38, 20.0 }
 0x2e5   :  { %464 = vpow2.f32 %v335_v40  ;;  %v337_v42 = vmul.f32 1.442695, %v334_v41 }
 0x2e7   :  { %466 = vpow2.f32 %v337_v42 }
 0x2ef   :  { %v465_v43 = vpop.eup %464 }
 0x2f0   :  { %v339_v44 = vadd.f32 1.0, %v465_v43  ;;  %v342_v47 = vmul.f32 -0.5, %v465_v43  ;;  %v345_v50 = vand.u32 2147483647, %v465_v43 }
 0x2f1   :  { %v467_v45 = vpop.eup %466 }
 0x2f2   :  { %468 = vlog2.f32 %v339_v44  ;;  %v348_v46 = vadd.f32 1.0, %v467_v45  ;;  %v351_v48 = vmul.f32 -0.5, %v467_v45  ;;  %v343_v49 = vadd.f32 1.0, %v342_v47 }
 0x2f3   :  { %v354_v53 = vand.u32 2147483647, %v467_v45  ;;  %vm346_vm3 = vcmp.lt.f32.partialorder %v345_v50, 0.0004427343 }
 0x2f4   :  { %470 = vlog2.f32 %v348_v46  ;;  %v352_v51 = vadd.f32 1.0, %v351_v48  ;;  %v344_v55 = vmul.f32 %v465_v43, %v343_v49 }
 0x2f5   :  { %vm355_vm5 = vcmp.lt.f32.partialorder %v354_v53, 0.0004427343 }
 0x2f6   :  { %v353_v59 = vmul.f32 %v467_v45, %v352_v51 }
 0x2fc   :  { %v469_v52 = vpop.eup %468 }
 0x2fd   :  { %v341_v54 = vmul.f32 0.6931472, %v469_v52 }
 0x2fe   :  { %v471_v56 = vpop.eup %470 }
 0x2ff   :  { %v347_v57 = vsel %vm346_vm3, %v344_v55, %v341_v54  ;;  %v350_v58 = vmul.f32 0.6931472, %v471_v56 }
 0x300   :  { %v357_v60 = vsel %vm331_vm4, %v325_v34, %v347_v57 }
 0x301   :  { %359 = vst [vmem:[#allocation10] sm:$0xff] %v357_v60  ;;  %v356_v61 = vsel %vm355_vm5, %v353_v59, %v350_v58 }
 0x302   :  { %v358_v62 = vsel %vm332_vm6, %v328_v38, %v356_v61 }
 0x303   :  { %360 = vst [vmem:[#allocation10 + $0x8] sm:$0xff] %v358_v62 }
 0x304   :  { %571 = shalt.err (!%p568_p8)
}
 0x305   :  { %s572_s9 = scalar_lea.hbm %s748_s7, 256 }
 0x306   :  { %p573_p9 = scmp.ne.s32.totalorder %s748_s7, %s572_s9  ;;  %p576_p10 = scmp.lt.u32.totalorder %s572_s9, %s748_s7 }
 0x308   :  { %p578_p11 = pnand %p576_p10, %p573_p9 }
 0x30a   :  { %581 = shalt.err (!%p578_p11)
}
 0x30b   :  { %s599_s16 = smov 128   ;;  %s600_s0 = smov 8  }
 0x30c   :  { %372 = dma.vmem_to_hbm [thread:$0]  %s367_s6, 256, %s748_s7, [#allocation4], %s599_s16, %s599_s16, %s600_s0  }
 0x30d   :  { %588 = dma.done.wait [#allocation4], 256  }
 0x30e   :  { %589 = vsyncadd [#allocation4], 4294967040 }
 0x30f   :  { %376 = vsyncpa [#allocation3], 1 }
 0x310   :  { %377 = vsyncpa [#allocation6], 1 }
 0x311   :  { %378 = vsyncpa [#allocation9], 1 }
 0x312   :  { %379 = vsyncpa [#allocation4], 1 }

</bundles_post_ra>
